<compile_context>
chip_gen: v5e
topology: v5e:2x2
jax: 0.10.0
libtpu: 0.0.40
codegen_flags: <defaults>
</compile_context>

<pallas_src>
import jax
import jax.numpy as jnp
from jax.experimental import pallas as pl
from jax.experimental.pallas import tpu as pltpu


_LANE_TILE = 2048          # batch tile on the lane axis (multiple of 128); tiny VMEM footprint
_PALLAS_MIN_BATCH = 1024   # below this, a fused XLA computation is strictly faster


def _mlp_kernel(w1_ref, b1_ref, w2_ref, b2_ref, xt_ref, ot_ref):
    """One lane-dense batch tile of the fused MLP.

    xt_ref: (3, TB) f32 in VMEM  -- features on sublanes, batch on lanes.
    ot_ref: (3, TB) f32 in VMEM  -- lane-dense output (unmasked vst).
    w1_ref (3, 8), b1_ref (1, 8), w2_ref (8, 3), b2_ref (1, 3) -- SMEM scalars, resident.
    """
    # Hoist the three input-feature rows once.
    xs = [xt_ref[pl.ds(i, 1), :] for i in range(3)]           # three (1, TB) vregs

    # Hidden layer: h_j = relu(sum_i w1[i, j] * x_i + b1[j]), unrolled over 8 units (VPU).
    hs = []
    for j in range(8):
        acc = xs[0] * w1_ref[0, j]
        acc = acc + xs[1] * w1_ref[1, j]
        acc = acc + xs[2] * w1_ref[2, j]
        acc = acc + b1_ref[0, j]
        hs.append(jnp.maximum(acc, 0.0))                      # ReLU on the VPU

    # Output layer: y_k = sum_j w2[j, k] * h_j + b2[k], unrolled over 3 outputs.
    for k in range(3):
        y = hs[0] * w2_ref[0, k]
        for j in range(1, 8):
            y = y + hs[j] * w2_ref[j, k]
        y = y + b2_ref[0, k]
        ot_ref[pl.ds(k, 1), :] = y


def _pallas_forward(x, w1, b1, w2, b2):
    B = x.shape[0]
    tb = _LANE_TILE
    bp = pl.cdiv(B, tb) * tb

    xt = x.T                                                  # (3, B): lane-dense batch axis
    if bp != B:
        xt = jnp.pad(xt, ((0, 0), (0, bp - B)))               # pad batch to a full lane tile

    smem = pl.BlockSpec(memory_space=pltpu.MemorySpace.SMEM)  # whole array, resident for all tiles
    cost = pl.CostEstimate(
        flops=2 * bp * (3 * 8 + 8 * 3),
        transcendentals=0,
        bytes_accessed=2 * bp * 3 * 4 + (3 * 8 + 8 + 8 * 3 + 3) * 4,
    )

    yt = pl.pallas_call(
        _mlp_kernel,
        out_shape=jax.ShapeDtypeStruct((3, bp), x.dtype),
        grid=(bp // tb,),
        in_specs=[
            smem, smem, smem, smem,                           # w1, b1, w2, b2 in SMEM
            pl.BlockSpec((3, tb), lambda i: (0, i)),          # x^T batch tile (double-buffered)
        ],
        out_specs=pl.BlockSpec((3, tb), lambda i: (0, i)),    # lane-dense output tile
        compiler_params=pltpu.CompilerParams(
            dimension_semantics=("parallel",),                # shard batch tiles across TCs on v7x
        ),
        cost_estimate=cost,
    )(w1, b1, w2, b2, xt)

    return yt[:, :B].T                                        # back to (B, 3)


def _xla_forward(x, w1, b1, w2, b2):
    h = jnp.maximum(x @ w1 + b1, 0.0)
    return h @ w2 + b2


def feedforward_insurability(x, w1, b1, w2, b2):
    """Forward pass of FeedForward_Insurability:  relu(x @ W1 + b1) @ W2 + b2.

    x: (B, 3) f32.  w1: (3, 8), b1: (1, 8), w2: (8, 3), b2: (1, 3)
    (weights pre-transposed to (in, out) vs PyTorch's (out, in) so the math is x @ W).
    Small batches fall back to fused XLA (Pallas launch/DMA overhead dwarfs the work);
    large batches use the lane-dense Pallas kernel, which is HBM-bandwidth bound.
    """
    if x.shape[0] < _PALLAS_MIN_BATCH:
        return _xla_forward(x, w1, b1, w2, b2)
    return _pallas_forward(x, w1, b1, w2, b2)


def init_params(key):
    # Mimic PyTorch's default Linear init: U(-1/sqrt(fan_in), 1/sqrt(fan_in)).
    k1, k2, k3, k4 = jax.random.split(key, 4)
    bound1 = 1.0 / jnp.sqrt(3.0)
    bound2 = 1.0 / jnp.sqrt(8.0)
    w1 = jax.random.uniform(k1, (3, 8), jnp.float32, -bound1, bound1)
    b1 = jax.random.uniform(k2, (1, 8), jnp.float32, -bound1, bound1)
    w2 = jax.random.uniform(k3, (8, 3), jnp.float32, -bound2, bound2)
    b2 = jax.random.uniform(k4, (1, 3), jnp.float32, -bound2, bound2)
    return w1, b1, w2, b2


if __name__ == "__main__":
    key = jax.random.PRNGKey(0)
    kx_small, kx_big, kp = jax.random.split(key, 3)
    w1, b1, w2, b2 = init_params(kp)

    # Small batch (module's natural use case): gated to the fused XLA path.
    x_small = jax.random.normal(kx_small, (8, 3), jnp.float32)
    out_small = jax.block_until_ready(feedforward_insurability(x_small, w1, b1, w2, b2))
    assert out_small.shape == (8, 3), out_small.shape
    assert jnp.allclose(out_small, _xla_forward(x_small, w1, b1, w2, b2), atol=1e-5, rtol=1e-5)

    # Larger batch: exercises the lane-dense Pallas kernel (batch deliberately not a
    # multiple of the lane tile to exercise the pad/slice path).
    batch = 4096 + 37
    x_big = jax.random.normal(kx_big, (batch, 3), jnp.float32)
    out_big = jax.block_until_ready(feedforward_insurability(x_big, w1, b1, w2, b2))
    assert out_big.shape == (batch, 3), out_big.shape
    ref_big = _xla_forward(x_big, w1, b1, w2, b2)
    assert jnp.allclose(out_big, ref_big, atol=1e-5, rtol=1e-5), "Pallas kernel mismatch vs reference"

    print("KERNEL_OK")
</pallas_src>

<mosaic_0001>
module attributes {stable_mosaic.version = 11 : i64} {
  func.func @_mlp_kernel(%arg0: i32, %arg1: memref<3x8xf32, #tpu.memory_space<smem>>, %arg2: memref<1x8xf32, #tpu.memory_space<smem>>, %arg3: memref<8x3xf32, #tpu.memory_space<smem>>, %arg4: memref<1x3xf32, #tpu.memory_space<smem>>, %arg5: memref<3x2048xf32, #tpu.memory_space<vmem>>, %arg6: memref<3x2048xf32, #tpu.memory_space<vmem>>) attributes {dimension_semantics = [#tpu.dimension_semantics<parallel>], iteration_bounds = array<i64: 3>, scalar_prefetch = 0 : i64, scratch_operands = 0 : i64, tpu.core_type = #tpu.core_type<tc>, window_params = [{transform_indices = @transform_0, window_bounds = array<i64: 3, 8>}, {transform_indices = @transform_1, window_bounds = array<i64: 1, 8>}, {transform_indices = @transform_2, window_bounds = array<i64: 8, 3>}, {transform_indices = @transform_3, window_bounds = array<i64: 1, 3>}, {transform_indices = @transform_4, window_bounds = array<i64: 3, 2048>}, {transform_indices = @transform_5, window_bounds = array<i64: 3, 2048>}]} {
    %c0 = arith.constant 0 : index
    %c0_0 = arith.constant 0 : index
    %0 = vector.load %arg5[%c0, %c0_0] : memref<3x2048xf32, #tpu.memory_space<vmem>>, vector<1x2048xf32>
    %c1 = arith.constant 1 : index
    %c0_1 = arith.constant 0 : index
    %1 = vector.load %arg5[%c1, %c0_1] : memref<3x2048xf32, #tpu.memory_space<vmem>>, vector<1x2048xf32>
    %c2 = arith.constant 2 : index
    %c0_2 = arith.constant 0 : index
    %2 = vector.load %arg5[%c2, %c0_2] : memref<3x2048xf32, #tpu.memory_space<vmem>>, vector<1x2048xf32>
    %c0_3 = arith.constant 0 : index
    %c0_4 = arith.constant 0 : index
    %3 = memref.load %arg1[%c0_3, %c0_4] : memref<3x8xf32, #tpu.memory_space<smem>>
    %4 = vector.broadcast %3 : f32 to vector<1x2048xf32>
    %5 = arith.mulf %0, %4 : vector<1x2048xf32>
    %c1_5 = arith.constant 1 : index
    %c0_6 = arith.constant 0 : index
    %6 = memref.load %arg1[%c1_5, %c0_6] : memref<3x8xf32, #tpu.memory_space<smem>>
    %7 = vector.broadcast %6 : f32 to vector<1x2048xf32>
    %8 = arith.mulf %1, %7 : vector<1x2048xf32>
    %9 = arith.addf %5, %8 : vector<1x2048xf32>
    %c2_7 = arith.constant 2 : index
    %c0_8 = arith.constant 0 : index
    %10 = memref.load %arg1[%c2_7, %c0_8] : memref<3x8xf32, #tpu.memory_space<smem>>
    %11 = vector.broadcast %10 : f32 to vector<1x2048xf32>
    %12 = arith.mulf %2, %11 : vector<1x2048xf32>
    %13 = arith.addf %9, %12 : vector<1x2048xf32>
    %c0_9 = arith.constant 0 : index
    %c0_10 = arith.constant 0 : index
    %14 = memref.load %arg2[%c0_9, %c0_10] : memref<1x8xf32, #tpu.memory_space<smem>>
    %15 = vector.broadcast %14 : f32 to vector<1x2048xf32>
    %16 = arith.addf %13, %15 : vector<1x2048xf32>
    %cst = arith.constant 0.000000e+00 : f32
    %17 = vector.broadcast %cst : f32 to vector<1x2048xf32>
    %18 = arith.maximumf %16, %17 : vector<1x2048xf32>
    %c0_11 = arith.constant 0 : index
    %c1_12 = arith.constant 1 : index
    %19 = memref.load %arg1[%c0_11, %c1_12] : memref<3x8xf32, #tpu.memory_space<smem>>
    %20 = vector.broadcast %19 : f32 to vector<1x2048xf32>
    %21 = arith.mulf %0, %20 : vector<1x2048xf32>
    %c1_13 = arith.constant 1 : index
    %c1_14 = arith.constant 1 : index
    %22 = memref.load %arg1[%c1_13, %c1_14] : memref<3x8xf32, #tpu.memory_space<smem>>
    %23 = vector.broadcast %22 : f32 to vector<1x2048xf32>
    %24 = arith.mulf %1, %23 : vector<1x2048xf32>
    %25 = arith.addf %21, %24 : vector<1x2048xf32>
    %c2_15 = arith.constant 2 : index
    %c1_16 = arith.constant 1 : index
    %26 = memref.load %arg1[%c2_15, %c1_16] : memref<3x8xf32, #tpu.memory_space<smem>>
    %27 = vector.broadcast %26 : f32 to vector<1x2048xf32>
    %28 = arith.mulf %2, %27 : vector<1x2048xf32>
    %29 = arith.addf %25, %28 : vector<1x2048xf32>
    %c0_17 = arith.constant 0 : index
    %c1_18 = arith.constant 1 : index
    %30 = memref.load %arg2[%c0_17, %c1_18] : memref<1x8xf32, #tpu.memory_space<smem>>
    %31 = vector.broadcast %30 : f32 to vector<1x2048xf32>
    %32 = arith.addf %29, %31 : vector<1x2048xf32>
    %cst_19 = arith.constant 0.000000e+00 : f32
    %33 = vector.broadcast %cst_19 : f32 to vector<1x2048xf32>
    %34 = arith.maximumf %32, %33 : vector<1x2048xf32>
    %c0_20 = arith.constant 0 : index
    %c2_21 = arith.constant 2 : index
    %35 = memref.load %arg1[%c0_20, %c2_21] : memref<3x8xf32, #tpu.memory_space<smem>>
    %36 = vector.broadcast %35 : f32 to vector<1x2048xf32>
    %37 = arith.mulf %0, %36 : vector<1x2048xf32>
    %c1_22 = arith.constant 1 : index
    %c2_23 = arith.constant 2 : index
    %38 = memref.load %arg1[%c1_22, %c2_23] : memref<3x8xf32, #tpu.memory_space<smem>>
    %39 = vector.broadcast %38 : f32 to vector<1x2048xf32>
    %40 = arith.mulf %1, %39 : vector<1x2048xf32>
    %41 = arith.addf %37, %40 : vector<1x2048xf32>
    %c2_24 = arith.constant 2 : index
    %c2_25 = arith.constant 2 : index
    %42 = memref.load %arg1[%c2_24, %c2_25] : memref<3x8xf32, #tpu.memory_space<smem>>
    %43 = vector.broadcast %42 : f32 to vector<1x2048xf32>
    %44 = arith.mulf %2, %43 : vector<1x2048xf32>
    %45 = arith.addf %41, %44 : vector<1x2048xf32>
    %c0_26 = arith.constant 0 : index
    %c2_27 = arith.constant 2 : index
    %46 = memref.load %arg2[%c0_26, %c2_27] : memref<1x8xf32, #tpu.memory_space<smem>>
    %47 = vector.broadcast %46 : f32 to vector<1x2048xf32>
    %48 = arith.addf %45, %47 : vector<1x2048xf32>
    %cst_28 = arith.constant 0.000000e+00 : f32
    %49 = vector.broadcast %cst_28 : f32 to vector<1x2048xf32>
    %50 = arith.maximumf %48, %49 : vector<1x2048xf32>
    %c0_29 = arith.constant 0 : index
    %c3 = arith.constant 3 : index
    %51 = memref.load %arg1[%c0_29, %c3] : memref<3x8xf32, #tpu.memory_space<smem>>
    %52 = vector.broadcast %51 : f32 to vector<1x2048xf32>
    %53 = arith.mulf %0, %52 : vector<1x2048xf32>
    %c1_30 = arith.constant 1 : index
    %c3_31 = arith.constant 3 : index
    %54 = memref.load %arg1[%c1_30, %c3_31] : memref<3x8xf32, #tpu.memory_space<smem>>
    %55 = vector.broadcast %54 : f32 to vector<1x2048xf32>
    %56 = arith.mulf %1, %55 : vector<1x2048xf32>
    %57 = arith.addf %53, %56 : vector<1x2048xf32>
    %c2_32 = arith.constant 2 : index
    %c3_33 = arith.constant 3 : index
    %58 = memref.load %arg1[%c2_32, %c3_33] : memref<3x8xf32, #tpu.memory_space<smem>>
    %59 = vector.broadcast %58 : f32 to vector<1x2048xf32>
    %60 = arith.mulf %2, %59 : vector<1x2048xf32>
    %61 = arith.addf %57, %60 : vector<1x2048xf32>
    %c0_34 = arith.constant 0 : index
    %c3_35 = arith.constant 3 : index
    %62 = memref.load %arg2[%c0_34, %c3_35] : memref<1x8xf32, #tpu.memory_space<smem>>
    %63 = vector.broadcast %62 : f32 to vector<1x2048xf32>
    %64 = arith.addf %61, %63 : vector<1x2048xf32>
    %cst_36 = arith.constant 0.000000e+00 : f32
    %65 = vector.broadcast %cst_36 : f32 to vector<1x2048xf32>
    %66 = arith.maximumf %64, %65 : vector<1x2048xf32>
    %c0_37 = arith.constant 0 : index
    %c4 = arith.constant 4 : index
    %67 = memref.load %arg1[%c0_37, %c4] : memref<3x8xf32, #tpu.memory_space<smem>>
    %68 = vector.broadcast %67 : f32 to vector<1x2048xf32>
    %69 = arith.mulf %0, %68 : vector<1x2048xf32>
    %c1_38 = arith.constant 1 : index
    %c4_39 = arith.constant 4 : index
    %70 = memref.load %arg1[%c1_38, %c4_39] : memref<3x8xf32, #tpu.memory_space<smem>>
    %71 = vector.broadcast %70 : f32 to vector<1x2048xf32>
    %72 = arith.mulf %1, %71 : vector<1x2048xf32>
    %73 = arith.addf %69, %72 : vector<1x2048xf32>
    %c2_40 = arith.constant 2 : index
    %c4_41 = arith.constant 4 : index
    %74 = memref.load %arg1[%c2_40, %c4_41] : memref<3x8xf32, #tpu.memory_space<smem>>
    %75 = vector.broadcast %74 : f32 to vector<1x2048xf32>
    %76 = arith.mulf %2, %75 : vector<1x2048xf32>
    %77 = arith.addf %73, %76 : vector<1x2048xf32>
    %c0_42 = arith.constant 0 : index
    %c4_43 = arith.constant 4 : index
    %78 = memref.load %arg2[%c0_42, %c4_43] : memref<1x8xf32, #tpu.memory_space<smem>>
    %79 = vector.broadcast %78 : f32 to vector<1x2048xf32>
    %80 = arith.addf %77, %79 : vector<1x2048xf32>
    %cst_44 = arith.constant 0.000000e+00 : f32
    %81 = vector.broadcast %cst_44 : f32 to vector<1x2048xf32>
    %82 = arith.maximumf %80, %81 : vector<1x2048xf32>
    %c0_45 = arith.constant 0 : index
    %c5 = arith.constant 5 : index
    %83 = memref.load %arg1[%c0_45, %c5] : memref<3x8xf32, #tpu.memory_space<smem>>
    %84 = vector.broadcast %83 : f32 to vector<1x2048xf32>
    %85 = arith.mulf %0, %84 : vector<1x2048xf32>
    %c1_46 = arith.constant 1 : index
    %c5_47 = arith.constant 5 : index
    %86 = memref.load %arg1[%c1_46, %c5_47] : memref<3x8xf32, #tpu.memory_space<smem>>
    %87 = vector.broadcast %86 : f32 to vector<1x2048xf32>
    %88 = arith.mulf %1, %87 : vector<1x2048xf32>
    %89 = arith.addf %85, %88 : vector<1x2048xf32>
    %c2_48 = arith.constant 2 : index
    %c5_49 = arith.constant 5 : index
    %90 = memref.load %arg1[%c2_48, %c5_49] : memref<3x8xf32, #tpu.memory_space<smem>>
    %91 = vector.broadcast %90 : f32 to vector<1x2048xf32>
    %92 = arith.mulf %2, %91 : vector<1x2048xf32>
    %93 = arith.addf %89, %92 : vector<1x2048xf32>
    %c0_50 = arith.constant 0 : index
    %c5_51 = arith.constant 5 : index
    %94 = memref.load %arg2[%c0_50, %c5_51] : memref<1x8xf32, #tpu.memory_space<smem>>
    %95 = vector.broadcast %94 : f32 to vector<1x2048xf32>
    %96 = arith.addf %93, %95 : vector<1x2048xf32>
    %cst_52 = arith.constant 0.000000e+00 : f32
    %97 = vector.broadcast %cst_52 : f32 to vector<1x2048xf32>
    %98 = arith.maximumf %96, %97 : vector<1x2048xf32>
    %c0_53 = arith.constant 0 : index
    %c6 = arith.constant 6 : index
    %99 = memref.load %arg1[%c0_53, %c6] : memref<3x8xf32, #tpu.memory_space<smem>>
    %100 = vector.broadcast %99 : f32 to vector<1x2048xf32>
    %101 = arith.mulf %0, %100 : vector<1x2048xf32>
    %c1_54 = arith.constant 1 : index
    %c6_55 = arith.constant 6 : index
    %102 = memref.load %arg1[%c1_54, %c6_55] : memref<3x8xf32, #tpu.memory_space<smem>>
    %103 = vector.broadcast %102 : f32 to vector<1x2048xf32>
    %104 = arith.mulf %1, %103 : vector<1x2048xf32>
    %105 = arith.addf %101, %104 : vector<1x2048xf32>
    %c2_56 = arith.constant 2 : index
    %c6_57 = arith.constant 6 : index
    %106 = memref.load %arg1[%c2_56, %c6_57] : memref<3x8xf32, #tpu.memory_space<smem>>
    %107 = vector.broadcast %106 : f32 to vector<1x2048xf32>
    %108 = arith.mulf %2, %107 : vector<1x2048xf32>
    %109 = arith.addf %105, %108 : vector<1x2048xf32>
    %c0_58 = arith.constant 0 : index
    %c6_59 = arith.constant 6 : index
    %110 = memref.load %arg2[%c0_58, %c6_59] : memref<1x8xf32, #tpu.memory_space<smem>>
    %111 = vector.broadcast %110 : f32 to vector<1x2048xf32>
    %112 = arith.addf %109, %111 : vector<1x2048xf32>
    %cst_60 = arith.constant 0.000000e+00 : f32
    %113 = vector.broadcast %cst_60 : f32 to vector<1x2048xf32>
    %114 = arith.maximumf %112, %113 : vector<1x2048xf32>
    %c0_61 = arith.constant 0 : index
    %c7 = arith.constant 7 : index
    %115 = memref.load %arg1[%c0_61, %c7] : memref<3x8xf32, #tpu.memory_space<smem>>
    %116 = vector.broadcast %115 : f32 to vector<1x2048xf32>
    %117 = arith.mulf %0, %116 : vector<1x2048xf32>
    %c1_62 = arith.constant 1 : index
    %c7_63 = arith.constant 7 : index
    %118 = memref.load %arg1[%c1_62, %c7_63] : memref<3x8xf32, #tpu.memory_space<smem>>
    %119 = vector.broadcast %118 : f32 to vector<1x2048xf32>
    %120 = arith.mulf %1, %119 : vector<1x2048xf32>
    %121 = arith.addf %117, %120 : vector<1x2048xf32>
    %c2_64 = arith.constant 2 : index
    %c7_65 = arith.constant 7 : index
    %122 = memref.load %arg1[%c2_64, %c7_65] : memref<3x8xf32, #tpu.memory_space<smem>>
    %123 = vector.broadcast %122 : f32 to vector<1x2048xf32>
    %124 = arith.mulf %2, %123 : vector<1x2048xf32>
    %125 = arith.addf %121, %124 : vector<1x2048xf32>
    %c0_66 = arith.constant 0 : index
    %c7_67 = arith.constant 7 : index
    %126 = memref.load %arg2[%c0_66, %c7_67] : memref<1x8xf32, #tpu.memory_space<smem>>
    %127 = vector.broadcast %126 : f32 to vector<1x2048xf32>
    %128 = arith.addf %125, %127 : vector<1x2048xf32>
    %cst_68 = arith.constant 0.000000e+00 : f32
    %129 = vector.broadcast %cst_68 : f32 to vector<1x2048xf32>
    %130 = arith.maximumf %128, %129 : vector<1x2048xf32>
    %c0_69 = arith.constant 0 : index
    %c0_70 = arith.constant 0 : index
    %131 = memref.load %arg3[%c0_69, %c0_70] : memref<8x3xf32, #tpu.memory_space<smem>>
    %132 = vector.broadcast %131 : f32 to vector<1x2048xf32>
    %133 = arith.mulf %18, %132 : vector<1x2048xf32>
    %c1_71 = arith.constant 1 : index
    %c0_72 = arith.constant 0 : index
    %134 = memref.load %arg3[%c1_71, %c0_72] : memref<8x3xf32, #tpu.memory_space<smem>>
    %135 = vector.broadcast %134 : f32 to vector<1x2048xf32>
    %136 = arith.mulf %34, %135 : vector<1x2048xf32>
    %137 = arith.addf %133, %136 : vector<1x2048xf32>
    %c2_73 = arith.constant 2 : index
    %c0_74 = arith.constant 0 : index
    %138 = memref.load %arg3[%c2_73, %c0_74] : memref<8x3xf32, #tpu.memory_space<smem>>
    %139 = vector.broadcast %138 : f32 to vector<1x2048xf32>
    %140 = arith.mulf %50, %139 : vector<1x2048xf32>
    %141 = arith.addf %137, %140 : vector<1x2048xf32>
    %c3_75 = arith.constant 3 : index
    %c0_76 = arith.constant 0 : index
    %142 = memref.load %arg3[%c3_75, %c0_76] : memref<8x3xf32, #tpu.memory_space<smem>>
    %143 = vector.broadcast %142 : f32 to vector<1x2048xf32>
    %144 = arith.mulf %66, %143 : vector<1x2048xf32>
    %145 = arith.addf %141, %144 : vector<1x2048xf32>
    %c4_77 = arith.constant 4 : index
    %c0_78 = arith.constant 0 : index
    %146 = memref.load %arg3[%c4_77, %c0_78] : memref<8x3xf32, #tpu.memory_space<smem>>
    %147 = vector.broadcast %146 : f32 to vector<1x2048xf32>
    %148 = arith.mulf %82, %147 : vector<1x2048xf32>
    %149 = arith.addf %145, %148 : vector<1x2048xf32>
    %c5_79 = arith.constant 5 : index
    %c0_80 = arith.constant 0 : index
    %150 = memref.load %arg3[%c5_79, %c0_80] : memref<8x3xf32, #tpu.memory_space<smem>>
    %151 = vector.broadcast %150 : f32 to vector<1x2048xf32>
    %152 = arith.mulf %98, %151 : vector<1x2048xf32>
    %153 = arith.addf %149, %152 : vector<1x2048xf32>
    %c6_81 = arith.constant 6 : index
    %c0_82 = arith.constant 0 : index
    %154 = memref.load %arg3[%c6_81, %c0_82] : memref<8x3xf32, #tpu.memory_space<smem>>
    %155 = vector.broadcast %154 : f32 to vector<1x2048xf32>
    %156 = arith.mulf %114, %155 : vector<1x2048xf32>
    %157 = arith.addf %153, %156 : vector<1x2048xf32>
    %c7_83 = arith.constant 7 : index
    %c0_84 = arith.constant 0 : index
    %158 = memref.load %arg3[%c7_83, %c0_84] : memref<8x3xf32, #tpu.memory_space<smem>>
    %159 = vector.broadcast %158 : f32 to vector<1x2048xf32>
    %160 = arith.mulf %130, %159 : vector<1x2048xf32>
    %161 = arith.addf %157, %160 : vector<1x2048xf32>
    %c0_85 = arith.constant 0 : index
    %c0_86 = arith.constant 0 : index
    %162 = memref.load %arg4[%c0_85, %c0_86] : memref<1x3xf32, #tpu.memory_space<smem>>
    %163 = vector.broadcast %162 : f32 to vector<1x2048xf32>
    %164 = arith.addf %161, %163 : vector<1x2048xf32>
    %c0_87 = arith.constant 0 : index
    %c0_88 = arith.constant 0 : index
    %165 = vector.load %arg6[%c0_87, %c0_88] : memref<3x2048xf32, #tpu.memory_space<vmem>>, vector<1x2048xf32>
    tpu.vector_store %arg6[%c0_87, %c0_88], %164 {strides = array<i32>} : memref<3x2048xf32, #tpu.memory_space<vmem>>, vector<1x2048xf32>,
    %c0_89 = arith.constant 0 : index
    %c1_90 = arith.constant 1 : index
    %166 = memref.load %arg3[%c0_89, %c1_90] : memref<8x3xf32, #tpu.memory_space<smem>>
    %167 = vector.broadcast %166 : f32 to vector<1x2048xf32>
    %168 = arith.mulf %18, %167 : vector<1x2048xf32>
    %c1_91 = arith.constant 1 : index
    %c1_92 = arith.constant 1 : index
    %169 = memref.load %arg3[%c1_91, %c1_92] : memref<8x3xf32, #tpu.memory_space<smem>>
    %170 = vector.broadcast %169 : f32 to vector<1x2048xf32>
    %171 = arith.mulf %34, %170 : vector<1x2048xf32>
    %172 = arith.addf %168, %171 : vector<1x2048xf32>
    %c2_93 = arith.constant 2 : index
    %c1_94 = arith.constant 1 : index
    %173 = memref.load %arg3[%c2_93, %c1_94] : memref<8x3xf32, #tpu.memory_space<smem>>
    %174 = vector.broadcast %173 : f32 to vector<1x2048xf32>
    %175 = arith.mulf %50, %174 : vector<1x2048xf32>
    %176 = arith.addf %172, %175 : vector<1x2048xf32>
    %c3_95 = arith.constant 3 : index
    %c1_96 = arith.constant 1 : index
    %177 = memref.load %arg3[%c3_95, %c1_96] : memref<8x3xf32, #tpu.memory_space<smem>>
    %178 = vector.broadcast %177 : f32 to vector<1x2048xf32>
    %179 = arith.mulf %66, %178 : vector<1x2048xf32>
    %180 = arith.addf %176, %179 : vector<1x2048xf32>
    %c4_97 = arith.constant 4 : index
    %c1_98 = arith.constant 1 : index
    %181 = memref.load %arg3[%c4_97, %c1_98] : memref<8x3xf32, #tpu.memory_space<smem>>
    %182 = vector.broadcast %181 : f32 to vector<1x2048xf32>
    %183 = arith.mulf %82, %182 : vector<1x2048xf32>
    %184 = arith.addf %180, %183 : vector<1x2048xf32>
    %c5_99 = arith.constant 5 : index
    %c1_100 = arith.constant 1 : index
    %185 = memref.load %arg3[%c5_99, %c1_100] : memref<8x3xf32, #tpu.memory_space<smem>>
    %186 = vector.broadcast %185 : f32 to vector<1x2048xf32>
    %187 = arith.mulf %98, %186 : vector<1x2048xf32>
    %188 = arith.addf %184, %187 : vector<1x2048xf32>
    %c6_101 = arith.constant 6 : index
    %c1_102 = arith.constant 1 : index
    %189 = memref.load %arg3[%c6_101, %c1_102] : memref<8x3xf32, #tpu.memory_space<smem>>
    %190 = vector.broadcast %189 : f32 to vector<1x2048xf32>
    %191 = arith.mulf %114, %190 : vector<1x2048xf32>
    %192 = arith.addf %188, %191 : vector<1x2048xf32>
    %c7_103 = arith.constant 7 : index
    %c1_104 = arith.constant 1 : index
    %193 = memref.load %arg3[%c7_103, %c1_104] : memref<8x3xf32, #tpu.memory_space<smem>>
    %194 = vector.broadcast %193 : f32 to vector<1x2048xf32>
    %195 = arith.mulf %130, %194 : vector<1x2048xf32>
    %196 = arith.addf %192, %195 : vector<1x2048xf32>
    %c0_105 = arith.constant 0 : index
    %c1_106 = arith.constant 1 : index
    %197 = memref.load %arg4[%c0_105, %c1_106] : memref<1x3xf32, #tpu.memory_space<smem>>
    %198 = vector.broadcast %197 : f32 to vector<1x2048xf32>
    %199 = arith.addf %196, %198 : vector<1x2048xf32>
    %c1_107 = arith.constant 1 : index
    %c0_108 = arith.constant 0 : index
    %200 = vector.load %arg6[%c1_107, %c0_108] : memref<3x2048xf32, #tpu.memory_space<vmem>>, vector<1x2048xf32>
    tpu.vector_store %arg6[%c1_107, %c0_108], %199 {strides = array<i32>} : memref<3x2048xf32, #tpu.memory_space<vmem>>, vector<1x2048xf32>,
    %c0_109 = arith.constant 0 : index
    %c2_110 = arith.constant 2 : index
    %201 = memref.load %arg3[%c0_109, %c2_110] : memref<8x3xf32, #tpu.memory_space<smem>>
    %202 = vector.broadcast %201 : f32 to vector<1x2048xf32>
    %203 = arith.mulf %18, %202 : vector<1x2048xf32>
    %c1_111 = arith.constant 1 : index
    %c2_112 = arith.constant 2 : index
    %204 = memref.load %arg3[%c1_111, %c2_112] : memref<8x3xf32, #tpu.memory_space<smem>>
    %205 = vector.broadcast %204 : f32 to vector<1x2048xf32>
    %206 = arith.mulf %34, %205 : vector<1x2048xf32>
    %207 = arith.addf %203, %206 : vector<1x2048xf32>
    %c2_113 = arith.constant 2 : index
    %c2_114 = arith.constant 2 : index
    %208 = memref.load %arg3[%c2_113, %c2_114] : memref<8x3xf32, #tpu.memory_space<smem>>
    %209 = vector.broadcast %208 : f32 to vector<1x2048xf32>
    %210 = arith.mulf %50, %209 : vector<1x2048xf32>
    %211 = arith.addf %207, %210 : vector<1x2048xf32>
    %c3_115 = arith.constant 3 : index
    %c2_116 = arith.constant 2 : index
    %212 = memref.load %arg3[%c3_115, %c2_116] : memref<8x3xf32, #tpu.memory_space<smem>>
    %213 = vector.broadcast %212 : f32 to vector<1x2048xf32>
    %214 = arith.mulf %66, %213 : vector<1x2048xf32>
    %215 = arith.addf %211, %214 : vector<1x2048xf32>
    %c4_117 = arith.constant 4 : index
    %c2_118 = arith.constant 2 : index
    %216 = memref.load %arg3[%c4_117, %c2_118] : memref<8x3xf32, #tpu.memory_space<smem>>
    %217 = vector.broadcast %216 : f32 to vector<1x2048xf32>
    %218 = arith.mulf %82, %217 : vector<1x2048xf32>
    %219 = arith.addf %215, %218 : vector<1x2048xf32>
    %c5_119 = arith.constant 5 : index
    %c2_120 = arith.constant 2 : index
    %220 = memref.load %arg3[%c5_119, %c2_120] : memref<8x3xf32, #tpu.memory_space<smem>>
    %221 = vector.broadcast %220 : f32 to vector<1x2048xf32>
    %222 = arith.mulf %98, %221 : vector<1x2048xf32>
    %223 = arith.addf %219, %222 : vector<1x2048xf32>
    %c6_121 = arith.constant 6 : index
    %c2_122 = arith.constant 2 : index
    %224 = memref.load %arg3[%c6_121, %c2_122] : memref<8x3xf32, #tpu.memory_space<smem>>
    %225 = vector.broadcast %224 : f32 to vector<1x2048xf32>
    %226 = arith.mulf %114, %225 : vector<1x2048xf32>
    %227 = arith.addf %223, %226 : vector<1x2048xf32>
    %c7_123 = arith.constant 7 : index
    %c2_124 = arith.constant 2 : index
    %228 = memref.load %arg3[%c7_123, %c2_124] : memref<8x3xf32, #tpu.memory_space<smem>>
    %229 = vector.broadcast %228 : f32 to vector<1x2048xf32>
    %230 = arith.mulf %130, %229 : vector<1x2048xf32>
    %231 = arith.addf %227, %230 : vector<1x2048xf32>
    %c0_125 = arith.constant 0 : index
    %c2_126 = arith.constant 2 : index
    %232 = memref.load %arg4[%c0_125, %c2_126] : memref<1x3xf32, #tpu.memory_space<smem>>
    %233 = vector.broadcast %232 : f32 to vector<1x2048xf32>
    %234 = arith.addf %231, %233 : vector<1x2048xf32>
    %c2_127 = arith.constant 2 : index
    %c0_128 = arith.constant 0 : index
    %235 = vector.load %arg6[%c2_127, %c0_128] : memref<3x2048xf32, #tpu.memory_space<vmem>>, vector<1x2048xf32>
    tpu.vector_store %arg6[%c2_127, %c0_128], %234 {strides = array<i32>} : memref<3x2048xf32, #tpu.memory_space<vmem>>, vector<1x2048xf32>,
    return
  }
  func.func @transform_0(%arg0: i32) -> (i32, i32) {
    %c0_i32 = arith.constant 0 : i32
    %c0_i32_0 = arith.constant 0 : i32
    %c0_i32_1 = arith.constant 0 : i32
    return %c0_i32, %c0_i32_0 : i32, i32
  }
  func.func @transform_1(%arg0: i32) -> (i32, i32) {
    %c0_i32 = arith.constant 0 : i32
    %c0_i32_0 = arith.constant 0 : i32
    %c0_i32_1 = arith.constant 0 : i32
    return %c0_i32, %c0_i32_0 : i32, i32
  }
  func.func @transform_2(%arg0: i32) -> (i32, i32) {
    %c0_i32 = arith.constant 0 : i32
    %c0_i32_0 = arith.constant 0 : i32
    %c0_i32_1 = arith.constant 0 : i32
    return %c0_i32, %c0_i32_0 : i32, i32
  }
  func.func @transform_3(%arg0: i32) -> (i32, i32) {
    %c0_i32 = arith.constant 0 : i32
    %c0_i32_0 = arith.constant 0 : i32
    %c0_i32_1 = arith.constant 0 : i32
    return %c0_i32, %c0_i32_0 : i32, i32
  }
  func.func @transform_4(%arg0: i32) -> (i32, i32) {
    %c0_i32 = arith.constant 0 : i32
    %c0_i32_0 = arith.constant 0 : i32
    return %c0_i32, %arg0 : i32, i32
  }
  func.func @transform_5(%arg0: i32) -> (i32, i32) {
    %c0_i32 = arith.constant 0 : i32
    %c0_i32_0 = arith.constant 0 : i32
    return %c0_i32, %arg0 : i32, i32
  }
}

</mosaic_0001>

<bundles_post_ra>
// kernel: tpu_custom_call.1
= control target key start
LH: loop header
LB: loop body
LE: loop exit
PB: predicated region body
PF: predicated region fallthrough
CT: control target
= control target key end

     0   :  { %10 = vsyncpa [#allocation5], 0  ;;  %s1641_s0 = inlined_call_operand.vmem [shape: f32[3,8], index: 0, kind: input, shape index: {}]   ;;  %s1642_s1 = inlined_call_operand.vmem [shape: f32[1,8], index: 1, kind: input, shape index: {}]   ;;  %s1643_s2 = inlined_call_operand.vmem [shape: f32[8,3], index: 2, kind: input, shape index: {}]   ;;  %s1644_s3 = inlined_call_operand.vmem [shape: f32[1,3], index: 3, kind: input, shape index: {}]   ;;  %s1645_s4 = inlined_call_operand.hbm [shape: f32[3,6144], index: 4, kind: input, shape index: {}]   ;;  %s1646_s5 = inlined_call_operand.hbm [shape: f32[3,6144], index: 5, kind: output, shape index: {}]  }
   0x1   :  { %11 = vsyncpa [#allocation7], 0 }
   0x2   :  { %12 = vsyncpa [#allocation10], 0 }
   0x3   :  { %13 = vsyncpa [#allocation3], 0 }
   0x4   :  { %15 = vsyncpa [#allocation3 + $0x1], 0 }
   0x5   :  { %16 = vsyncpa [#allocation4], 0 }
   0x6   :  { %18 = vsyncpa [#allocation4 + $0x1], 0  ;;  %s1153_s18 = smov 0   ;;  %s1155_s19 = smov 0  }
   0x7   :  { %s1157_s20 = smov 0   ;;  %s1159_s21 = smov 0  }
   0x8 LB: > { %s187_s24 = sshll.u32 %s1642_s1, 4  ;;  %s1177_s25 = sadd.s32 4294967295, %s1117_s21   ;;  %s1117_s21 = sphi %s1159_s21, %s1656_s21   ;;  %s1113_s20 = sphi %s1157_s20, %s1655_s20   ;;  %s1109_s19 = sphi %s1155_s19, %s1654_s19   ;;  %s1105_s18 = sphi %s1153_s18, %s1653_s18   ;;  %s188_s24 = int_to_ptr.vmem [resolvable:$true] %s187_s24 }
   0x9   : > { %p774_p0 = scmp.ge.s32.totalorder %s1117_s21, 1  ;;  %p129_p1 = scmp.eq.s32.totalorder %s1177_s25, 0 }
   0xa   : > { %p165_p2 = scmp.lt.s32.totalorder %s1117_s21, 4  ;;  %s177_s29 = sshll.u32 %s1641_s0, 4  ;;  %s178_s29 = int_to_ptr.vmem [resolvable:$true] %s177_s29 }
   0xb   : > { %s197_s7 = sshll.u32 %s1643_s2, 4  ;;  %s207_s10 = sshll.u32 %s1644_s3, 4  ;;  %s198_s7 = int_to_ptr.vmem [resolvable:$true] %s197_s7  ;;  %s208_s10 = int_to_ptr.vmem [resolvable:$true] %s207_s10 }
   0xc   : > { %p1182_p3 = pnand %p774_p0, %p165_p2  ;;  %s1119_s11 = smov [#allocation6]  }
   0xd   : > { %s1120_s12 = smov [#allocation2]   ;;  %s1121_s13 = smov [#allocation8]  }
   0xe   : > { %p882_p4 = pneg %p1182_p3  ;;  %s1122_s14 = smov [#allocation9]  }
   0xf   : > { %s773_s15 = sadd.s32 4294967294, %s1117_s21   ;;  %s1201_s16 = sadd.s32 1, %s1117_s21  }
  0x10   : > { %p883_p5 = pnand %p882_p4, %p129_p1  ;;  %s112_s17 = ssub.s32 %s1117_s21, %s1201_s16 }
  0x11   : > { %s115_s22 = sadd.s32 1, %s1113_s20  ;;  %p113_p6 = scmp.eq.s32.totalorder %s112_s17, 0 }
  0x12   : > { %888 = dma.vmem_to_smem (!%p883_p5), %s188_s24, 16, %s1119_s11, [#allocation7]  }
  0x13   : > { %885 = dma.vmem_to_smem (!%p883_p5), %s178_s29, 64, %s1120_s12, [#allocation5]  }
  0x14   : > { %891 = dma.vmem_to_smem (!%p883_p5), %s198_s7, 128, %s1121_s13, [#allocation7]  }
  0x15   : > { %894 = dma.vmem_to_smem (!%p883_p5), %s208_s10, 16, %s1122_s14, [#allocation10]  }
  0x16   : > { %p122_p7 = scmp.ne.s32.totalorder %s1113_s20, %s1109_s19  ;;  %p123_p8 = scmp.eq.s32.totalorder %s1117_s21, 0 }
  0x17   : > { %p128_p9 = scmp.ne.s32.totalorder %s1109_s19, %s1105_s18  ;;  %p152_p12 = scmp.eq.s32.totalorder %s1177_s25, 2 }
  0x18   : > { %s1212_s23 = scalar_select %p113_p6, %s1113_s20, %s115_s22  }
  0x19   : > { %p1214_p10 = por %p123_p8, %p122_p7  ;;  %p1220_p11 = por %p129_p1, %p128_p9 }
  0x1a   : > { %p158_p13 = scmp.eq.s32.totalorder %s773_s15, 2  ;;  %p907_p0 = scmp.lt.s32.totalorder %s1117_s21, 3 }
  0x1b   : > { %s218_s28 = sand.u32 1, %s1113_s20   ;;  %p1227_p2 = por %p152_p12, %p122_p7 }
  0x1c   : > { %p1231_p4 = por %p158_p13, %p128_p9  ;;  %s780_s6 = sshll.u32 %s218_s28, 6 }
  0x1d   : > { %s860_s7 = sshll.u32 %s1117_s21, 6  ;;  %s222_s11 = scalar_lea.vmem [#allocation11], %s780_s6 }
  0x1e   : > { %s227_s10 = scalar_lea.hbm %s1645_s4, %s860_s7  ;;  %s231_s12 = sshll.u32 %s222_s11, 4  ;;  %s232_s12 = int_to_ptr.vmem [resolvable:$true] %s231_s12 }
  0x1f   : > { %s229_s13 = sshll.u32 %s227_s10, 4  ;;  %p1241_p5 = pnand %p907_p0, %p1214_p10  ;;  %s230_s13 = int_to_ptr.hbm [resolvable:$true] %s229_s13 }
  0x20   : > { %s219_s15 = scalar_lea.sflag [#allocation3], %s218_s28  ;;  %s1009_s17 = sshra.s32 %s230_s13, 4  ;;  %s1010_s17 = int_to_ptr.hbm [resolvable:$true] %s1009_s17 }
  0x21   : > { %s1011_s22 = scalar_lea.hbm %s1010_s17, 64  ;;  %p1013_p7 = pneg %p1241_p5 }
  0x22   : > { %p1012_p6 = scmp.ne.s32.totalorder %s1010_s17, %s1011_s22  ;;  %s1016_s8 = scalar_lea.hbm %s1645_s4, 192 }
  0x23   : > { %p1017_p10 = scmp.lt.s32.totalorder %s1010_s17, %s1645_s4  ;;  %p1018_p12 = scmp.lt.s32.totalorder %s1016_s8, %s1011_s22 }
  0x24   : > { %p1014_p8 = pnand %p1013_p7, %p1012_p6 }
  0x25   : > { %p1019_p13 = por %p1018_p12, %p1017_p10 }
  0x26   : > { %p1015_p9 = pneg %p1014_p8 }
  0x28   : > { %p1020_p0 = pnand %p1019_p13, %p1015_p9 }
  0x2a   : > { %1023 = shalt.err (!%p1020_p0)
}
  0x2b   : > { %898 = dma.hbm_to_vmem [thread:$0]  (!%p1241_p5), %s230_s13, 1024, %s232_s12, %s219_s15  }
  0x2c   : > { %240 = sbr.rel (%p1182_p3) target bundleno = 148 (0x94), region = 40 }
  0x31   : > { %1084 = dma.done.wait (%p129_p1), [#allocation5], 64  }
  0x32   : > { %1086 = vsyncadd (%p129_p1), [#allocation5], 4294967232 }
  0x33   : > { %1088 = dma.done.wait (%p129_p1), [#allocation7], 144  }
  0x34   : > { %1090 = vsyncadd (%p129_p1), [#allocation7], 4294967152 }
  0x35   : > { %1092 = dma.done.wait (%p129_p1), [#allocation10], 16  }
  0x36   : > { %1094 = vsyncadd (%p129_p1), [#allocation10], 4294967280  ;;  %s1270_s26 = sand.u32 1, %s1109_s19  }
  0x37   : > { %s788_s28 = sshll.u32 %s1270_s26, 6  ;;  %s263_s10 = scalar_lea.sflag [#allocation3], %s1270_s26 }
  0x38   : > { %s266_s11 = scalar_lea.vmem [#allocation11], %s788_s28 }
  0x39   : > { %1096 = dma.done.wait (%p1220_p11), %s263_s10, 1024  }
  0x3a   : > { %1098 = vsyncadd (%p1220_p11), %s263_s10, 4294966272 }
  0x3b   : > { %272 = sfence }
  0x3c   : > { %s308_s12 = sld [smem:[#allocation2]]  ;;  %v1282_v0 = vld [vmem:[%s266_s11] ss:$4 sm:$0xff]  ;;  %v1286_v2 = vld [vmem:[%s266_s11 + $0x1] ss:$4 sm:$0xff] }
  0x3d   : > { %s795_s13 = sld [smem:[#allocation2 + $0x80]]  ;;  %v1284_v1 = vld [vmem:[%s266_s11 + $0x20] ss:$4 sm:$0xff]  ;;  %v1290_v3 = vld [vmem:[%s266_s11 + $0x21] ss:$4 sm:$0xff] }
  0x3e   : > { %s796_s14 = sld [smem:[#allocation2 + $0x100]]  ;;  %v1292_v4 = vld [vmem:[%s266_s11 + $0x2] ss:$4 sm:$0xff] }
  0x3f   : > { %s1280_s15 = sld [smem:[#allocation6]]  ;;  %v1294_v6 = vld [vmem:[%s266_s11 + $0x22] ss:$4 sm:$0xff] }
  0x40   : > { %s797_s17 = sld [smem:[#allocation2 + $0x1]] }
  0x41   : > { %s1288_s22 = sld [smem:[#allocation2 + $0x81]] }
  0x42   : > { %v309_v5 = vstv %s308_s12  ;;  %s799_s27 = sld [smem:[#allocation2 + $0x101]] }
  0x43   : > { %v310_v7 = vmul.f32 %v309_v5, %v1282_v0  ;;  %v313_v8 = vstv %s795_s13  ;;  %s1297_s6 = sld [smem:[#allocation6 + $0x1]]  ;;  %v311_v9 = vmul.f32 %v1284_v1, %v309_v5 }
  0x44   : > { %v314_v10 = vmul.f32 %v1286_v2, %v313_v8  ;;  %v319_v11 = vstv %s796_s14  ;;  %s1301_s7 = sld [smem:[#allocation2 + $0x2]]  ;;  %v315_v12 = vmul.f32 %v1290_v3, %v313_v8 }
  0x45   : > { %v320_v13 = vmul.f32 %v1292_v4, %v319_v11  ;;  %s1305_s8 = sld [smem:[#allocation2 + $0x82]]  ;;  %v321_v14 = vmul.f32 %v1294_v6, %v319_v11  ;;  %v325_v18 = vstv %s1280_s15 }
  0x46   : > { %v316_v15 = vadd.f32 %v314_v10, %v310_v7  ;;  %v331_v16 = vstv %s797_s17  ;;  %s1308_s9 = sld [smem:[#allocation2 + $0x102]]  ;;  %v317_v17 = vadd.f32 %v315_v12, %v311_v9 }
  0x47   : > { %v332_v19 = vmul.f32 %v331_v16, %v1282_v0  ;;  %v335_v20 = vstv %s1288_s22  ;;  %s1313_s24 = sld [smem:[#allocation6 + $0x2]]  ;;  %v333_v21 = vmul.f32 %v1284_v1, %v331_v16 }
  0x48   : > { %v322_v22 = vadd.f32 %v320_v13, %v316_v15  ;;  %v336_v23 = vmul.f32 %v1286_v2, %v335_v20  ;;  %v341_v24 = vstv %s799_s27  ;;  %s1317_s10 = sld [smem:[#allocation2 + $0x3]]  ;;  %v323_v25 = vadd.f32 %v321_v14, %v317_v17 }
  0x49   : > { %v342_v26 = vmul.f32 %v1292_v4, %v341_v24  ;;  %s1320_s11 = sld [smem:[#allocation2 + $0x83]]  ;;  %v337_v27 = vmul.f32 %v1290_v3, %v335_v20  ;;  %v343_v28 = vmul.f32 %v1294_v6, %v341_v24  ;;  %v347_v31 = vstv %s1297_s6 }
  0x4a   : > { %v326_v29 = vadd.f32 %v325_v18, %v322_v22  ;;  %v338_v30 = vadd.f32 %v336_v23, %v332_v19  ;;  %v353_v32 = vstv %s1301_s7  ;;  %s1326_s12 = sld [smem:[#allocation2 + $0x103]]  ;;  %v327_v35 = vadd.f32 %v325_v18, %v323_v25 }
  0x4b   : > { %v354_v33 = vmul.f32 %v353_v32, %v1282_v0  ;;  %v357_v34 = vstv %s1305_s8  ;;  %s1330_s13 = sld [smem:[#allocation6 + $0x3]]  ;;  %v339_v36 = vadd.f32 %v337_v27, %v333_v21  ;;  %v355_v40 = vmul.f32 %v1284_v1, %v353_v32 }
  0x4c   : > { %v344_v37 = vadd.f32 %v342_v26, %v338_v30  ;;  %v358_v38 = vmul.f32 %v1286_v2, %v357_v34  ;;  %v363_v39 = vstv %s1308_s9  ;;  %s1334_s14 = sld [smem:[#allocation2 + $0x4]]  ;;  %v1337_v41 = vmax.f32 %v326_v29, 0.0 }
  0x4d   : > { %v364_v42 = vmul.f32 %v1292_v4, %v363_v39  ;;  %v369_v43 = vstv %s1313_s24  ;;  %s1341_s15 = sld [smem:[#allocation2 + $0x84]]  ;;  %v345_v44 = vadd.f32 %v343_v28, %v339_v36  ;;  %v359_v48 = vmul.f32 %v1290_v3, %v357_v34 }
  0x4e   : > { %v348_v45 = vadd.f32 %v347_v31, %v344_v37  ;;  %v360_v46 = vadd.f32 %v358_v38, %v354_v33  ;;  %v375_v47 = vstv %s1317_s10  ;;  %s1344_s17 = sld [smem:[#allocation2 + $0x104]]  ;;  %v1351_v51 = vmax.f32 %v327_v35, 0.0 }
  0x4f   : > { %v376_v49 = vmul.f32 %v375_v47, %v1282_v0  ;;  %v379_v50 = vstv %s1320_s11  ;;  %s1349_s22 = sld [smem:[#allocation6 + $0x4]]  ;;  %v365_v52 = vmul.f32 %v1294_v6, %v363_v39  ;;  %v349_v56 = vadd.f32 %v347_v31, %v345_v44 }
  0x50   : > { %v366_v53 = vadd.f32 %v364_v42, %v360_v46  ;;  %v380_v54 = vmul.f32 %v1286_v2, %v379_v50  ;;  %v385_v55 = vstv %s1326_s12  ;;  %s1356_s27 = sld [smem:[#allocation2 + $0x5]]  ;;  %v1358_v57 = vmax.f32 %v348_v45, 0.0 }
  0x51   : > { %v386_v58 = vmul.f32 %v1292_v4, %v385_v55  ;;  %v391_v59 = vstv %s1330_s13  ;;  %s1362_s6 = sld [smem:[#allocation2 + $0x85]]  ;;  %v361_v60 = vadd.f32 %v359_v48, %v355_v40  ;;  %v377_v5 = vmul.f32 %v1284_v1, %v375_v47 }
  0x52   : > { %v370_v61 = vadd.f32 %v369_v43, %v366_v53  ;;  %v382_v62 = vadd.f32 %v380_v54, %v376_v49  ;;  %v397_v63 = vstv %s1334_s14  ;;  %s1365_s7 = sld [smem:[#allocation2 + $0x105]]  ;;  %v381_v10 = vmul.f32 %v1290_v3, %v379_v50 }
  0x53   : > { %v398_v7 = vmul.f32 %v397_v63, %v1282_v0  ;;  %v401_v8 = vstv %s1341_s15  ;;  %s1370_s8 = sld [smem:[#allocation6 + $0x5]]  ;;  %v367_v9 = vadd.f32 %v365_v52, %v361_v60  ;;  %v1377_v14 = vmax.f32 %v349_v56, 0.0 }
  0x54   : > { %v388_v11 = vadd.f32 %v386_v58, %v382_v62  ;;  %v402_v12 = vmul.f32 %v1286_v2, %v401_v8  ;;  %v407_v13 = vstv %s1344_s17  ;;  %s1375_s9 = sld [smem:[#allocation2 + $0x6]]  ;;  %v1379_v15 = vmax.f32 %v370_v61, 0.0 }
  0x55   : > { %v408_v16 = vmul.f32 %v1292_v4, %v407_v13  ;;  %s1382_s24 = sld [smem:[#allocation2 + $0x86]]  ;;  %v371_v17 = vadd.f32 %v369_v43, %v367_v9  ;;  %v383_v18 = vadd.f32 %v381_v10, %v377_v5  ;;  %v413_v20 = vstv %s1349_s22 }
  0x56   : > { %v404_v19 = vadd.f32 %v402_v12, %v398_v7  ;;  %v419_v21 = vstv %s1356_s27  ;;  %s1386_s10 = sld [smem:[#allocation2 + $0x106]]  ;;  %v387_v22 = vmul.f32 %v1294_v6, %v385_v55  ;;  %v392_v23 = vadd.f32 %v391_v59, %v388_v11 }
  0x57   : > { %v420_v24 = vmul.f32 %v419_v21, %v1282_v0  ;;  %v423_v25 = vstv %s1362_s6  ;;  %s1391_s11 = sld [smem:[#allocation6 + $0x6]]  ;;  %v399_v26 = vmul.f32 %v1284_v1, %v397_v63  ;;  %v1398_v30 = vmax.f32 %v371_v17, 0.0 }
  0x58   : > { %v410_v27 = vadd.f32 %v408_v16, %v404_v19  ;;  %v424_v28 = vmul.f32 %v1286_v2, %v423_v25  ;;  %v429_v29 = vstv %s1365_s7  ;;  %s1396_s12 = sld [smem:[#allocation2 + $0x7]]  ;;  %v389_v33 = vadd.f32 %v387_v22, %v383_v18 }
  0x59   : > { %v430_v31 = vmul.f32 %v1292_v4, %v429_v29  ;;  %v435_v32 = vstv %s1370_s8  ;;  %s1402_s13 = sld [smem:[#allocation2 + $0x87]]  ;;  %v403_v34 = vmul.f32 %v1290_v3, %v401_v8  ;;  %v409_v38 = vmul.f32 %v1294_v6, %v407_v13 }
  0x5a   : > { %v414_v35 = vadd.f32 %v413_v20, %v410_v27  ;;  %v426_v36 = vadd.f32 %v424_v28, %v420_v24  ;;  %v441_v37 = vstv %s1375_s9  ;;  %s1406_s14 = sld [smem:[#allocation2 + $0x107]]  ;;  %v393_v42 = vadd.f32 %v391_v59, %v389_v33 }
  0x5b   : > { %v442_v39 = vmul.f32 %v441_v37, %v1282_v0  ;;  %v445_v40 = vstv %s1382_s24  ;;  %s1411_s15 = sld [smem:[#allocation6 + $0x7]]  ;;  %v405_v43 = vadd.f32 %v403_v34, %v399_v26  ;;  %v1413_v44 = vmax.f32 %v392_v23, 0.0 }
  0x5c   : > { %v432_v45 = vadd.f32 %v430_v31, %v426_v36  ;;  %v446_v46 = vmul.f32 %v1286_v2, %v445_v40  ;;  %v451_v47 = vstv %s1386_s10  ;;  %s1417_s17 = sld [smem:[#allocation8]]  ;;  %v1419_v48 = vmax.f32 %v414_v35, 0.0 }
  0x5d   : > { %v452_v49 = vmul.f32 %v1292_v4, %v451_v47  ;;  %v457_v50 = vstv %s1391_s11  ;;  %s1423_s22 = sld [smem:[#allocation8 + $0x80]]  ;;  %v411_v52 = vadd.f32 %v409_v38, %v405_v43  ;;  %v421_v56 = vmul.f32 %v1284_v1, %v419_v21 }
  0x5e   : > { %v436_v53 = vadd.f32 %v435_v32, %v432_v45  ;;  %v448_v54 = vadd.f32 %v446_v46, %v442_v39  ;;  %v463_v55 = vstv %s1396_s12  ;;  %s1428_s27 = sld [smem:[#allocation8 + $0x100]]  ;;  %v1435_v60 = vmax.f32 %v393_v42, 0.0 }
  0x5f   : > { %v464_v58 = vmul.f32 %v463_v55, %v1282_v0  ;;  %v467_v59 = vstv %s1402_s13  ;;  %s1433_s6 = sld [smem:[#allocation8 + $0x180]]  ;;  %v425_v61 = vmul.f32 %v1290_v3, %v423_v25  ;;  %v415_v7 = vadd.f32 %v413_v20, %v411_v52 }
  0x60   : > { %v454_v62 = vadd.f32 %v452_v49, %v448_v54  ;;  %v468_v63 = vmul.f32 %v1286_v2, %v467_v59  ;;  %v473_v5 = vstv %s1406_s14  ;;  %s1440_s7 = sld [smem:[#allocation8 + $0x200]]  ;;  %v1442_v8 = vmax.f32 %v436_v53, 0.0 }
  0x61   : > { %v474_v0 = vmul.f32 %v1292_v4, %v473_v5  ;;  %v479_v9 = vstv %s1411_s15  ;;  %s1446_s9 = sld [smem:[#allocation8 + $0x280]]  ;;  %v427_v10 = vadd.f32 %v425_v61, %v421_v56  ;;  %v431_v2 = vmul.f32 %v1294_v6, %v429_v29 }
  0x62   : > { %v458_v11 = vadd.f32 %v457_v50, %v454_v62  ;;  %v470_v12 = vadd.f32 %v468_v63, %v464_v58  ;;  %v485_v13 = vstv %s1417_s17  ;;  %s1451_s24 = sld [smem:[#allocation8 + $0x300]]  ;;  %v443_v4 = vmul.f32 %v1284_v1, %v441_v37 }
  0x63   : > { %v486_v16 = vmul.f32 %v485_v13, %v1337_v41  ;;  %v489_v17 = vstv %s1423_s22  ;;  %s1456_s10 = sld [smem:[#allocation8 + $0x380]]  ;;  %v447_v18 = vmul.f32 %v1290_v3, %v445_v40  ;;  %v433_v25 = vadd.f32 %v431_v2, %v427_v10 }
  0x64   : > { %v1460_v19 = vmax.f32 %v458_v11, 0.0  ;;  %v476_v20 = vadd.f32 %v474_v0, %v470_v12  ;;  %v490_v21 = vmul.f32 %v489_v17, %v1358_v57  ;;  %v495_v22 = vstv %s1428_s27  ;;  %s1464_s12 = sld [smem:[#allocation9]] }
  0x65   : > { %v496_v23 = vmul.f32 %v495_v22, %v1379_v15  ;;  %v501_v24 = vstv %s1433_s6  ;;  %v449_v26 = vadd.f32 %v447_v18, %v443_v4  ;;  %s1468_s13 = sld [smem:[#allocation8 + $0x1]]  ;;  %v1477_v34 = vmax.f32 %v415_v7, 0.0 }
  0x66   : > { %v480_v27 = vadd.f32 %v479_v9, %v476_v20  ;;  %v492_v28 = vadd.f32 %v490_v21, %v486_v16  ;;  %v502_v29 = vmul.f32 %v501_v24, %v1413_v44  ;;  %v507_v31 = vstv %s1440_s7  ;;  %s1474_s14 = sld [smem:[#allocation8 + $0x81]] }
  0x67   : > { %v513_v33 = vstv %s1446_s9  ;;  %v437_v35 = vadd.f32 %v435_v32, %v433_v25  ;;  %v453_v36 = vmul.f32 %v1294_v6, %v451_v47  ;;  %s1482_s17 = sld [smem:[#allocation8 + $0x101]]  ;;  %v508_v39 = vmul.f32 %v507_v31, %v1419_v48 }
  0x68   : > { %v1484_v37 = vmax.f32 %v480_v27, 0.0  ;;  %v498_v38 = vadd.f32 %v496_v23, %v492_v28  ;;  %v519_v40 = vstv %s1451_s24  ;;  %s1488_s22 = sld [smem:[#allocation8 + $0x181]]  ;;  %v514_v42 = vmul.f32 %v513_v33, %v1442_v8 }
  0x69   : > { %v520_v43 = vmul.f32 %v519_v40, %v1460_v19  ;;  %v525_v45 = vstv %s1456_s10  ;;  %v455_v32 = vadd.f32 %v453_v36, %v449_v26  ;;  %s1493_s8 = sld [smem:[#allocation8 + $0x201]]  ;;  %v1496_v49 = vmax.f32 %v437_v35, 0.0 }
  0x6a   : > { %v504_v46 = vadd.f32 %v502_v29, %v498_v38  ;;  %v526_v47 = vmul.f32 %v525_v45, %v1484_v37  ;;  %v465_v52 = vmul.f32 %v1284_v1, %v463_v55  ;;  %s1499_s27 = sld [smem:[#allocation8 + $0x281]]  ;;  %v469_v54 = vmul.f32 %v1290_v3, %v467_v59 }
  0x6b   : > { %v459_v53 = vadd.f32 %v457_v50, %v455_v32  ;;  %v475_v56 = vmul.f32 %v1294_v6, %v473_v5  ;;  %v487_v58 = vmul.f32 %v485_v13, %v1351_v51  ;;  %s1506_s6 = sld [smem:[#allocation8 + $0x301]]  ;;  %v531_v62 = vstv %s1464_s12 }
  0x6c   : > { %v510_v61 = vadd.f32 %v508_v39, %v504_v46  ;;  %v491_v63 = vmul.f32 %v489_v17, %v1377_v14  ;;  %v497_v1 = vmul.f32 %v495_v22, %v1398_v30  ;;  %s1511_s7 = sld [smem:[#allocation8 + $0x381]]  ;;  %v471_v50 = vadd.f32 %v469_v54, %v465_v52 }
  0x6d   : > { %v1513_v55 = vmax.f32 %v459_v53, 0.0  ;;  %v503_v3 = vmul.f32 %v501_v24, %v1435_v60  ;;  %v509_v6 = vmul.f32 %v507_v31, %v1477_v34  ;;  %v538_v7 = vstv %s1468_s13  ;;  %s1519_s11 = sld [smem:[#allocation9 + $0x1]] }
  0x6e   : > { %v516_v59 = vadd.f32 %v514_v42, %v510_v61  ;;  %v493_v5 = vadd.f32 %v491_v63, %v487_v58  ;;  %v542_v0 = vstv %s1474_s14  ;;  %v477_v10 = vadd.f32 %v475_v56, %v471_v50  ;;  %s1524_s9 = sld [smem:[#allocation8 + $0x2]] }
  0x6f   : > { %v515_v11 = vmul.f32 %v513_v33, %v1496_v49  ;;  %v539_v12 = vmul.f32 %v538_v7, %v1337_v41  ;;  %v543_v13 = vmul.f32 %v542_v0, %v1358_v57  ;;  %v548_v17 = vstv %s1482_s17  ;;  %s1528_s24 = sld [smem:[#allocation8 + $0x82]]  ;;  %s1556_s17 = scalar_lea.vmem [#allocation12], %s788_s28 }
  0x70   : > { %v522_v2 = vadd.f32 %v520_v43, %v516_v59  ;;  %v499_v16 = vadd.f32 %v497_v1, %v493_v5  ;;  %v554_v4 = vstv %s1488_s22  ;;  %v481_v18 = vadd.f32 %v479_v9, %v477_v10  ;;  %s1534_s10 = sld [smem:[#allocation8 + $0x102]] }
  0x71   : > { %v545_v20 = vadd.f32 %v543_v13, %v539_v12  ;;  %v549_v21 = vmul.f32 %v548_v17, %v1379_v15  ;;  %v555_v22 = vmul.f32 %v554_v4, %v1413_v44  ;;  %v560_v25 = vstv %s1493_s8  ;;  %s1538_s13 = sld [smem:[#allocation8 + $0x182]]  ;;  %s861_s8 = sshll.u32 %s1177_s25, 6 }
  0x72   : > { %v528_v23 = vadd.f32 %v526_v47, %v522_v2  ;;  %v505_v24 = vadd.f32 %v503_v3, %v499_v16  ;;  %v566_v26 = vstv %s1499_s27  ;;  %v1540_v27 = vmax.f32 %v481_v18, 0.0  ;;  %s1544_s15 = sld [smem:[#allocation8 + $0x202]]  ;;  %s646_s25 = scalar_lea.sflag [#allocation4], %s1270_s26 }
  0x73   : > { %v521_v9 = vmul.f32 %v519_v40, %v1513_v55  ;;  %v551_v28 = vadd.f32 %v549_v21, %v545_v20  ;;  %v561_v29 = vmul.f32 %v560_v25, %v1419_v48  ;;  %v572_v35 = vstv %s1506_s6  ;;  %s1552_s14 = sld [smem:[#allocation8 + $0x282]] }
  0x74   : > { %v532_v31 = vadd.f32 %v531_v62, %v528_v23  ;;  %v511_v33 = vadd.f32 %v509_v6, %v505_v24  ;;  %v578_v36 = vstv %s1511_s7  ;;  %v527_v38 = vmul.f32 %v525_v45, %v1540_v27  ;;  %s1565_s28 = sld [smem:[#allocation8 + $0x302]]  ;;  %s657_s7 = scalar_lea.hbm %s1646_s5, %s861_s8 }
  0x75   : > { %v557_v39 = vadd.f32 %v555_v22, %v551_v28  ;;  %v567_v42 = vmul.f32 %v566_v26, %v1442_v8  ;;  %v573_v43 = vmul.f32 %v572_v35, %v1460_v19  ;;  %v540_v32 = vmul.f32 %v538_v7, %v1351_v51  ;;  %s1572_s22 = sld [smem:[#allocation8 + $0x382]] }
  0x76   : > { %534 = vst [vmem:[%s1556_s17] ss:$4 sm:$0xff] %v532_v31  ;;  %v517_v40 = vadd.f32 %v515_v11, %v511_v33  ;;  %v544_v46 = vmul.f32 %v542_v0, %v1377_v14  ;;  %v579_v47 = vmul.f32 %v578_v36, %v1484_v37  ;;  %v584_v52 = vstv %s1519_s11  ;;  %s1589_s12 = sld [smem:[#allocation9 + $0x2]]  ;;  %s659_s11 = sshll.u32 %s1556_s17, 4  ;;  %s660_s11 = int_to_ptr.vmem [resolvable:$true] %s659_s11 }
  0x77   : > { %v563_v45 = vadd.f32 %v561_v29, %v557_v39  ;;  %v550_v53 = vmul.f32 %v548_v17, %v1398_v30  ;;  %v556_v58 = vmul.f32 %v554_v4, %v1435_v60  ;;  %v562_v61 = vmul.f32 %v560_v25, %v1477_v34 }
  0x78   : > { %v523_v54 = vadd.f32 %v521_v9, %v517_v40  ;;  %v546_v56 = vadd.f32 %v544_v46, %v540_v32  ;;  %v568_v1 = vmul.f32 %v566_v26, %v1496_v49  ;;  %v592_v50 = vstv %s1524_s9  ;;  %s661_s9 = sshll.u32 %s657_s7, 4  ;;  %s662_s9 = int_to_ptr.hbm [resolvable:$true] %s661_s9 }
  0x79   : > { %v569_v63 = vadd.f32 %v567_v42, %v563_v45  ;;  %v596_v3 = vstv %s1528_s24  ;;  %v593_v5 = vmul.f32 %v592_v50, %v1337_v41  ;;  %v602_v10 = vstv %s1534_s10  ;;  %s1053_s24 = sshra.s32 %s662_s9, 4  ;;  %s1054_s24 = int_to_ptr.hbm [resolvable:$true] %s1053_s24 }
  0x7a   : > { %v529_v6 = vadd.f32 %v527_v38, %v523_v54  ;;  %v552_v59 = vadd.f32 %v550_v53, %v546_v56  ;;  %v597_v7 = vmul.f32 %v596_v3, %v1358_v57  ;;  %v608_v11 = vstv %s1538_s13  ;;  %s1055_s10 = scalar_lea.hbm %s1054_s24, 64  ;;  %p1060_p5 = scmp.lt.s32.totalorder %s1054_s24, %s1646_s5 }
  0x7b   : > { %v575_v0 = vadd.f32 %v573_v43, %v569_v63  ;;  %v614_v12 = vstv %s1544_s15  ;;  %v603_v17 = vmul.f32 %v602_v10, %v1379_v15  ;;  %v609_v18 = vmul.f32 %v608_v11, %v1413_v44  ;;  %p1056_p1 = scmp.ne.s32.totalorder %s1054_s24, %s1055_s10 }
  0x7c   : > { %v533_v13 = vadd.f32 %v531_v62, %v529_v6  ;;  %v558_v2 = vadd.f32 %v556_v58, %v552_v59  ;;  %v599_v16 = vadd.f32 %v597_v7, %v593_v5  ;;  %v620_v20 = vstv %s1552_s14  ;;  %s1059_s14 = scalar_lea.hbm %s1646_s5, 192 }
  0x7d   : > { %v581_v4 = vadd.f32 %v579_v47, %v575_v0  ;;  %v574_v57 = vmul.f32 %v572_v35, %v1513_v55  ;;  %v615_v22 = vmul.f32 %v614_v12, %v1419_v48  ;;  %v580_v62 = vmul.f32 %v578_v36, %v1540_v27  ;;  %p1057_p3 = pnand %p1056_p1, %p1227_p2  ;;  %p1061_p6 = scmp.lt.s32.totalorder %s1059_s14, %s1055_s10 }
  0x7e   : > { %832 = vst [vmem:[%s1556_s17 + $0x20] ss:$4 sm:$0xff] %v533_v13  ;;  %v564_v41 = vadd.f32 %v562_v61, %v558_v2  ;;  %v605_v21 = vadd.f32 %v603_v17, %v599_v16  ;;  %v626_v24 = vstv %s1565_s28  ;;  %v621_v26 = vmul.f32 %v620_v20, %v1442_v8 }
  0x7f   : > { %v585_v23 = vadd.f32 %v584_v52, %v581_v4  ;;  %v594_v44 = vmul.f32 %v592_v50, %v1351_v51  ;;  %v632_v9 = vstv %s1572_s22  ;;  %v598_v28 = vmul.f32 %v596_v3, %v1377_v14  ;;  %p1058_p11 = pneg %p1057_p3  ;;  %p1062_p7 = por %p1061_p6, %p1060_p5 }
  0x80   : > { %v570_v15 = vadd.f32 %v568_v1, %v564_v41  ;;  %v611_v25 = vadd.f32 %v609_v18, %v605_v21  ;;  %v604_v29 = vmul.f32 %v602_v10, %v1398_v30  ;;  %v627_v33 = vmul.f32 %v626_v24, %v1460_v19 }
  0x81   : > { %842 = vst [vmem:[%s1556_s17 + $0x1] ss:$4 sm:$0xff] %v585_v23  ;;  %v600_v35 = vadd.f32 %v598_v28, %v594_v44  ;;  %v610_v36 = vmul.f32 %v608_v11, %v1435_v60  ;;  %v633_v51 = vmul.f32 %v632_v9, %v1484_v37  ;;  %v616_v42 = vmul.f32 %v614_v12, %v1477_v34  ;;  %p1063_p8 = pnand %p1062_p7, %p1058_p11 }
  0x82   : > { %v576_v48 = vadd.f32 %v574_v57, %v570_v15  ;;  %v617_v31 = vadd.f32 %v615_v22, %v611_v25  ;;  %v638_v40 = vstv %s1589_s12  ;;  %v622_v32 = vmul.f32 %v620_v20, %v1496_v49 }
  0x83   : > { %v606_v39 = vadd.f32 %v604_v29, %v600_v35  ;;  %v628_v46 = vmul.f32 %v626_v24, %v1513_v55  ;;  %v634_v47 = vmul.f32 %v632_v9, %v1540_v27 }
  0x84   : > { %v582_v38 = vadd.f32 %v580_v62, %v576_v48  ;;  %v623_v8 = vadd.f32 %v621_v26, %v617_v31 }
  0x85   : > { %v612_v43 = vadd.f32 %v610_v36, %v606_v39 }
  0x86   : > { %v586_v14 = vadd.f32 %v584_v52, %v582_v38  ;;  %v629_v30 = vadd.f32 %v627_v33, %v623_v8 }
  0x87   : > { %v618_v60 = vadd.f32 %v616_v42, %v612_v43 }
  0x88   : > { %843 = vst [vmem:[%s1556_s17 + $0x21] ss:$4 sm:$0xff] %v586_v14  ;;  %v635_v19 = vadd.f32 %v633_v51, %v629_v30 }
  0x89   : > { %v624_v45 = vadd.f32 %v622_v32, %v618_v60 }
  0x8a   : > { %v639_v37 = vadd.f32 %v638_v40, %v635_v19 }
  0x8b   : > { %v630_v34 = vadd.f32 %v628_v46, %v624_v45 }
  0x8c   : > { %853 = vst [vmem:[%s1556_s17 + $0x2] ss:$4 sm:$0xff] %v639_v37 }
  0x8d   : > { %v636_v49 = vadd.f32 %v634_v47, %v630_v34 }
  0x8f   : > { %v640_v52 = vadd.f32 %v638_v40, %v636_v49 }
  0x91   : > { %854 = vst [vmem:[%s1556_s17 + $0x22] ss:$4 sm:$0xff] %v640_v52 }
  0x92   : > { %1066 = shalt.err (!%p1063_p8)
}
  0x93   : > { %880 = dma.vmem_to_hbm [thread:$0]  (%p1227_p2), %s660_s11, 1024, %s662_s9, %s646_s25  }
  0x94 PF: > { %p912_p9 = scmp.ge.s32.totalorder %s1117_s21, 2  ;;  %s673_s26 = sand.u32 1, %s1105_s18  }
  0x95   : > { %s674_s17 = scalar_lea.sflag [#allocation4], %s673_s26 }
  0x96   : > { %p900_p10 = pnand %p912_p9, %p1231_p4 }
  0x98   : > { %p901_p12 = pneg %p900_p10 }
  0x9a   : > { %1100 = dma.done.wait (%p901_p12), %s674_s17, 1024  }
  0x9b   : > { %1102 = vsyncadd (%p901_p12), %s674_s17, 4294966272  ;;  %p21_p13 = scmp.ge.s32.totalorder %s1201_s16, 5   ;;  %s1653_s18 = smov %s1109_s19 }
  0x9c   : > { %s1654_s19 = smov %s1113_s20  ;;  %s1655_s20 = smov %s1212_s23 }
  0x9d   : > { %s1656_s21 = smov %s1201_s16  ;;  %23 = sbr.rel (!%p21_p13) target bundleno = 8 (0x8), region = 112 }
  0xa2   :  { %680 = vsyncpa [#allocation3], 1 }
  0xa3   :  { %682 = vsyncpa [#allocation3 + $0x1], 1 }
  0xa4   :  { %683 = vsyncpa [#allocation4], 1 }
  0xa5   :  { %685 = vsyncpa [#allocation4 + $0x1], 1 }
  0xa6   :  { %686 = vsyncpa [#allocation5], 1 }
  0xa7   :  { %688 = vsyncpa [#allocation5 + $0x1], 1 }
  0xa8   :  { %689 = vsyncpa [#allocation7], 1 }
  0xa9   :  { %690 = vsyncpa [#allocation10], 1 }

</bundles_post_ra>
